<compile_context>
chip_gen: v7x
topology: tpu7x:2x2x1
jax: 0.10.0
libtpu: 0.0.40
codegen_flags: <defaults>
</compile_context>

<pallas_src>
import functools

import jax
import jax.numpy as jnp
from jax.experimental import pallas as pl
from jax.experimental.pallas import tpu as pltpu


def _round_up(x, m):
    return (x + m - 1) // m * m


# --------------------------------------------------------------------------
# Kernel
# --------------------------------------------------------------------------
def _znet_kernel(z_mel_ref, z_text_ref, params_ref, out_ref, *,
                 z_dim, d_mel, d_text, r_mel, r_text, r_comb, r_head, r_bias):
    f32 = jnp.float32
    cdt = params_ref.dtype          # matmul-input dtype (bfloat16)
    W = 2 * z_dim

    # Static row-range views into the packed parameter blob (zero-cost slices).
    w_mel = params_ref[r_mel:r_mel + d_mel, :]        # (d_mel,  2z)  cols [0,z) real
    w_text = params_ref[r_text:r_text + d_text, :]    # (d_text, 2z)  cols [z,2z) real
    w_comb = params_ref[r_comb:r_comb + W, :]         # (2z, 2z)      cols [0,z) real
    w_head = params_ref[r_head:r_head + W, :]         # (2z, 2z)      [w_mu | w_logvar]
    b_mel = params_ref[r_bias + 0:r_bias + 1, :].astype(f32)   # (1, 2z)
    b_text = params_ref[r_bias + 1:r_bias + 2, :].astype(f32)
    b_comb = params_ref[r_bias + 2:r_bias + 3, :].astype(f32)
    b_head = params_ref[r_bias + 3:r_bias + 4, :].astype(f32)  # [b_mu | b_logvar]

    zm = z_mel_ref[...].astype(cdt)
    zt = z_text_ref[...].astype(cdt)

    # [relu(fc_mel(z_mel)) | 0] and [0 | relu(fc_text(z_text))]; their sum is
    # exactly torch.cat((h_mel, h_text), dim=1) since the padded halves are 0.
    h_mel = jnp.maximum(jnp.dot(zm, w_mel, preferred_element_type=f32) + b_mel, 0.0)
    h_text = jnp.maximum(jnp.dot(zt, w_text, preferred_element_type=f32) + b_text, 0.0)
    h_cat = h_mel + h_text                                       # (B, 2z) f32

    # h = relu(fc_combine(h_cat))  -- single matmul, K = 2*z_dim
    h = jnp.maximum(
        jnp.dot(h_cat.astype(cdt), w_comb, preferred_element_type=f32) + b_comb, 0.0)

    # Fused heads: head = [mu | logvar]  (single matmul, lane-dense 2z output)
    head = jnp.dot(h.astype(cdt), w_head, preferred_element_type=f32) + b_head

    # softplus(logvar) + 1e-8 on the logvar lanes only (no lane slicing needed).
    softplus = jnp.maximum(head, 0.0) + jnp.log1p(jnp.exp(-jnp.abs(head))) + 1e-8
    lane = jax.lax.broadcasted_iota(jnp.int32, head.shape, 1)
    out_ref[...] = jnp.where(lane < z_dim, head, softplus).astype(out_ref.dtype)


# --------------------------------------------------------------------------
# Parameter packing: one contiguous bf16 blob, 2*z_dim columns wide.
# --------------------------------------------------------------------------
def pack_znet_params(p, z_mel_dim, z_text_dim, z_dim, dtype=jnp.bfloat16):
    W = 2 * z_dim
    ALIGN = 16  # bf16 sublane-packing granularity

    r_mel = 0
    r_text = _round_up(r_mel + z_mel_dim, ALIGN)
    r_comb = _round_up(r_text + z_text_dim, ALIGN)
    r_head = _round_up(r_comb + W, ALIGN)
    r_bias = _round_up(r_head + W, ALIGN)
    n_rows = _round_up(r_bias + 4, ALIGN)

    blob = jnp.zeros((n_rows, W), jnp.float32)
    # fc_mel  -> columns [0, z_dim)        (mel half of the concat)
    blob = blob.at[r_mel:r_mel + z_mel_dim, :z_dim].set(p["w_mel"])
    # fc_text -> columns [z_dim, 2*z_dim)  (text half of the concat)
    blob = blob.at[r_text:r_text + z_text_dim, z_dim:].set(p["w_text"])
    # fc_combine consumes all 2*z_dim concat columns, writes [0, z_dim)
    blob = blob.at[r_comb:r_comb + W, :z_dim].set(p["w_comb"])
    # fused heads: rows [0, z_dim) real; cols [0,z)=mu, [z,2z)=logvar
    blob = blob.at[r_head:r_head + z_dim, :z_dim].set(p["w_mu"])
    blob = blob.at[r_head:r_head + z_dim, z_dim:].set(p["w_lv"])
    # biases, one row each
    blob = blob.at[r_bias + 0, :z_dim].set(p["b_mel"])
    blob = blob.at[r_bias + 1, z_dim:].set(p["b_text"])
    blob = blob.at[r_bias + 2, :z_dim].set(p["b_comb"])
    blob = blob.at[r_bias + 3, :z_dim].set(p["b_mu"])
    blob = blob.at[r_bias + 3, z_dim:].set(p["b_lv"])

    layout = dict(z_dim=z_dim, d_mel=z_mel_dim, d_text=z_text_dim,
                  r_mel=r_mel, r_text=r_text, r_comb=r_comb,
                  r_head=r_head, r_bias=r_bias)
    return blob.astype(dtype), layout


def init_znet_params(key, z_mel_dim, z_text_dim, z_dim):
    """Synthetic params matching nn.Linear shapes, stored (in, out); 1-D biases."""
    ks = jax.random.split(key, 10)

    def lin(kw, kb, d_in, d_out):
        bound = 1.0 / jnp.sqrt(jnp.float32(d_in))
        w = jax.random.uniform(kw, (d_in, d_out), jnp.float32, -bound, bound)
        b = jax.random.uniform(kb, (d_out,), jnp.float32, -bound, bound)
        return w, b

    w_mel, b_mel = lin(ks[0], ks[1], z_mel_dim, z_dim)
    w_text, b_text = lin(ks[2], ks[3], z_text_dim, z_dim)
    w_comb, b_comb = lin(ks[4], ks[5], 2 * z_dim, z_dim)
    w_mu, b_mu = lin(ks[6], ks[7], z_dim, z_dim)
    w_lv, b_lv = lin(ks[8], ks[9], z_dim, z_dim)

    raw = dict(w_mel=w_mel, b_mel=b_mel, w_text=w_text, b_text=b_text,
               w_comb=w_comb, b_comb=b_comb, w_mu=w_mu, b_mu=b_mu,
               w_lv=w_lv, b_lv=b_lv)
    blob, layout = pack_znet_params(raw, z_mel_dim, z_text_dim, z_dim)
    return raw, blob, layout


# --------------------------------------------------------------------------
# Wrapper
# --------------------------------------------------------------------------
def znet_forward(z_mel, z_text, blob, layout):
    B = z_mel.shape[0]
    z_dim = layout["z_dim"]
    W = 2 * z_dim

    kernel = functools.partial(_znet_kernel, **layout)
    vmem = pl.BlockSpec(memory_space=pltpu.MemorySpace.VMEM)

    flops = 2 * B * W * (layout["d_mel"] + layout["d_text"] + W + W)
    transcendentals = 2 * B * W  # exp + log1p on the head tile
    bytes_accessed = (z_mel.size * z_mel.dtype.itemsize
                      + z_text.size * z_text.dtype.itemsize
                      + blob.size * blob.dtype.itemsize
                      + B * W * 4)

    out = pl.pallas_call(
        kernel,
        out_shape=jax.ShapeDtypeStruct((B, W), jnp.float32),
        in_specs=[vmem, vmem, vmem],
        out_specs=vmem,
        cost_estimate=pl.CostEstimate(flops=flops,
                                      transcendentals=transcendentals,
                                      bytes_accessed=bytes_accessed),
    )(z_mel, z_text, blob)

    # out = [mu | softplus(logvar)+1e-8]
    return out[:, :z_dim], out[:, z_dim:]


# --------------------------------------------------------------------------
# References
# --------------------------------------------------------------------------
def znet_reference(z_mel, z_text, p):
    """Pure-f32 reference matching the PyTorch module exactly."""
    h_mel = jax.nn.relu(z_mel @ p["w_mel"] + p["b_mel"])
    h_text = jax.nn.relu(z_text @ p["w_text"] + p["b_text"])
    h_cat = jnp.concatenate([h_mel, h_text], axis=1)
    h = jax.nn.relu(h_cat @ p["w_comb"] + p["b_comb"])
    mu = h @ p["w_mu"] + p["b_mu"]
    lv = h @ p["w_lv"] + p["b_lv"]
    return mu, jax.nn.softplus(lv) + 1e-8


def znet_reference_bf16(z_mel, z_text, p):
    """Reference mirroring the kernel's numerics (bf16 matmul inputs, f32 acc)."""
    bf16, f32 = jnp.bfloat16, jnp.float32

    def q(x):  # bf16 quantize (as stored in the packed blob)
        return x.astype(bf16)

    def dot(a, b):
        return jnp.dot(a.astype(bf16), b.astype(bf16), preferred_element_type=f32)

    h_mel = jax.nn.relu(dot(z_mel, p["w_mel"]) + q(p["b_mel"]).astype(f32))
    h_text = jax.nn.relu(dot(z_text, p["w_text"]) + q(p["b_text"]).astype(f32))
    h_cat = jnp.concatenate([h_mel, h_text], axis=1)
    h = jax.nn.relu(dot(h_cat, p["w_comb"]) + q(p["b_comb"]).astype(f32))
    mu = dot(h, p["w_mu"]) + q(p["b_mu"]).astype(f32)
    lv = dot(h, p["w_lv"]) + q(p["b_lv"]).astype(f32)
    return mu, jax.nn.softplus(lv) + 1e-8


# --------------------------------------------------------------------------
if __name__ == "__main__":
    B = 8
    Z_MEL_DIM = 16
    Z_TEXT_DIM = 24
    Z_DIM = 32

    key = jax.random.PRNGKey(0)
    k_mel, k_text, k_params = jax.random.split(key, 3)

    z_mel = jax.random.normal(k_mel, (B, Z_MEL_DIM), jnp.float32)
    z_text = jax.random.normal(k_text, (B, Z_TEXT_DIM), jnp.float32)
    raw, blob, layout = init_znet_params(k_params, Z_MEL_DIM, Z_TEXT_DIM, Z_DIM)

    mu, var = znet_forward(z_mel, z_text, blob, layout)
    jax.block_until_ready((mu, var))

    # Exact-numerics check against a reference that mirrors the kernel's
    # bf16-matmul / f32-accumulate path.
    mu_bf, var_bf = znet_reference_bf16(z_mel, z_text, raw)
    assert jnp.allclose(mu, mu_bf, atol=1e-3, rtol=1e-3)
    assert jnp.allclose(var, var_bf, atol=1e-3, rtol=1e-3)

    # Semantic check against the full-f32 PyTorch math (bf16 quantization budget).
    mu_ref, var_ref = znet_reference(z_mel, z_text, raw)
    assert jnp.allclose(mu, mu_ref, atol=1e-1, rtol=1e-1)
    assert jnp.allclose(var, var_ref, atol=1e-1, rtol=1e-1)

    print("KERNEL_OK")
</pallas_src>

<mosaic_0001>
module attributes {stable_mosaic.version = 11 : i64} {
  func.func @_znet_kernel(%arg0: memref<8x16xf32, #tpu.memory_space<vmem>>, %arg1: memref<8x24xf32, #tpu.memory_space<vmem>>, %arg2: memref<192x64xbf16, #tpu.memory_space<vmem>>, %arg3: memref<8x64xf32, #tpu.memory_space<vmem>>) attributes {dimension_semantics = [], scalar_prefetch = 0 : i64, scratch_operands = 0 : i64, tpu.core_type = #tpu.core_type<tc>} {
    %c0 = arith.constant 0 : index
    %c0_0 = arith.constant 0 : index
    %0 = vector.load %arg2[%c0, %c0_0] : memref<192x64xbf16, #tpu.memory_space<vmem>>, vector<16x64xbf16>
    %c16 = arith.constant 16 : index
    %c0_1 = arith.constant 0 : index
    %1 = vector.load %arg2[%c16, %c0_1] : memref<192x64xbf16, #tpu.memory_space<vmem>>, vector<24x64xbf16>
    %c48 = arith.constant 48 : index
    %c0_2 = arith.constant 0 : index
    %2 = vector.load %arg2[%c48, %c0_2] : memref<192x64xbf16, #tpu.memory_space<vmem>>, vector<64x64xbf16>
    %c112 = arith.constant 112 : index
    %c0_3 = arith.constant 0 : index
    %3 = vector.load %arg2[%c112, %c0_3] : memref<192x64xbf16, #tpu.memory_space<vmem>>, vector<64x64xbf16>
    %c176 = arith.constant 176 : index
    %c0_4 = arith.constant 0 : index
    %4 = vector.load %arg2[%c176, %c0_4] : memref<192x64xbf16, #tpu.memory_space<vmem>>, vector<1x64xbf16>
    %5 = arith.extf %4 : vector<1x64xbf16> to vector<1x64xf32>
    %c177 = arith.constant 177 : index
    %c0_5 = arith.constant 0 : index
    %6 = vector.load %arg2[%c177, %c0_5] : memref<192x64xbf16, #tpu.memory_space<vmem>>, vector<1x64xbf16>
    %7 = arith.extf %6 : vector<1x64xbf16> to vector<1x64xf32>
    %c178 = arith.constant 178 : index
    %c0_6 = arith.constant 0 : index
    %8 = vector.load %arg2[%c178, %c0_6] : memref<192x64xbf16, #tpu.memory_space<vmem>>, vector<1x64xbf16>
    %9 = arith.extf %8 : vector<1x64xbf16> to vector<1x64xf32>
    %c179 = arith.constant 179 : index
    %c0_7 = arith.constant 0 : index
    %10 = vector.load %arg2[%c179, %c0_7] : memref<192x64xbf16, #tpu.memory_space<vmem>>, vector<1x64xbf16>
    %11 = arith.extf %10 : vector<1x64xbf16> to vector<1x64xf32>
    %c0_8 = arith.constant 0 : index
    %c0_9 = arith.constant 0 : index
    %12 = vector.load %arg0[%c0_8, %c0_9] : memref<8x16xf32, #tpu.memory_space<vmem>>, vector<8x16xf32>
    %13 = arith.truncf %12 : vector<8x16xf32> to vector<8x16xbf16>
    %c0_10 = arith.constant 0 : index
    %c0_11 = arith.constant 0 : index
    %14 = vector.load %arg1[%c0_10, %c0_11] : memref<8x24xf32, #tpu.memory_space<vmem>>, vector<8x24xf32>
    %15 = arith.truncf %14 : vector<8x24xf32> to vector<8x24xbf16>
    %cst = arith.constant dense<0.000000e+00> : vector<8x64xf32>
    %16 = tpu.matmul %13, %0, %cst {dimension_numbers = #tpu.dot_dimension_numbers<[1], [0], [0], [1], [0, 0, 1, 1], [], []>} : vector<8x16xbf16>, vector<16x64xbf16>, vector<8x64xf32> -> vector<8x64xf32>
    %17 = vector.broadcast %5 : vector<1x64xf32> to vector<8x64xf32>
    %18 = arith.addf %16, %17 : vector<8x64xf32>
    %cst_12 = arith.constant 0.000000e+00 : f32
    %19 = vector.broadcast %cst_12 : f32 to vector<8x64xf32>
    %20 = arith.maximumf %18, %19 : vector<8x64xf32>
    %cst_13 = arith.constant dense<0.000000e+00> : vector<8x64xf32>
    %21 = tpu.matmul %15, %1, %cst_13 {dimension_numbers = #tpu.dot_dimension_numbers<[1], [0], [0], [1], [0, 0, 1, 1], [], []>} : vector<8x24xbf16>, vector<24x64xbf16>, vector<8x64xf32> -> vector<8x64xf32>
    %22 = vector.broadcast %7 : vector<1x64xf32> to vector<8x64xf32>
    %23 = arith.addf %21, %22 : vector<8x64xf32>
    %cst_14 = arith.constant 0.000000e+00 : f32
    %24 = vector.broadcast %cst_14 : f32 to vector<8x64xf32>
    %25 = arith.maximumf %23, %24 : vector<8x64xf32>
    %26 = arith.addf %20, %25 : vector<8x64xf32>
    %27 = arith.truncf %26 : vector<8x64xf32> to vector<8x64xbf16>
    %cst_15 = arith.constant dense<0.000000e+00> : vector<8x64xf32>
    %28 = tpu.matmul %27, %2, %cst_15 {dimension_numbers = #tpu.dot_dimension_numbers<[1], [0], [0], [1], [0, 0, 1, 1], [], []>} : vector<8x64xbf16>, vector<64x64xbf16>, vector<8x64xf32> -> vector<8x64xf32>
    %29 = vector.broadcast %9 : vector<1x64xf32> to vector<8x64xf32>
    %30 = arith.addf %28, %29 : vector<8x64xf32>
    %cst_16 = arith.constant 0.000000e+00 : f32
    %31 = vector.broadcast %cst_16 : f32 to vector<8x64xf32>
    %32 = arith.maximumf %30, %31 : vector<8x64xf32>
    %33 = arith.truncf %32 : vector<8x64xf32> to vector<8x64xbf16>
    %cst_17 = arith.constant dense<0.000000e+00> : vector<8x64xf32>
    %34 = tpu.matmul %33, %3, %cst_17 {dimension_numbers = #tpu.dot_dimension_numbers<[1], [0], [0], [1], [0, 0, 1, 1], [], []>} : vector<8x64xbf16>, vector<64x64xbf16>, vector<8x64xf32> -> vector<8x64xf32>
    %35 = vector.broadcast %11 : vector<1x64xf32> to vector<8x64xf32>
    %36 = arith.addf %34, %35 : vector<8x64xf32>
    %cst_18 = arith.constant 0.000000e+00 : f32
    %37 = vector.broadcast %cst_18 : f32 to vector<8x64xf32>
    %38 = arith.maximumf %36, %37 : vector<8x64xf32>
    %39 = math.absf %36 : vector<8x64xf32>
    %cst_19 = arith.constant 0.000000e+00 : f32
    %40 = vector.broadcast %cst_19 : f32 to vector<8x64xf32>
    %41 = arith.subf %40, %39 : vector<8x64xf32>
    %42 = math.exp %41 : vector<8x64xf32>
    %43 = math.log1p %42 : vector<8x64xf32>
    %44 = arith.addf %38, %43 : vector<8x64xf32>
    %cst_20 = arith.constant 9.99999993E-9 : f32
    %45 = vector.broadcast %cst_20 : f32 to vector<8x64xf32>
    %46 = arith.addf %44, %45 : vector<8x64xf32>
    %47 = tpu.iota {dimensions = array<i32: 1>} : vector<8x64xi32>
    %c32_i32 = arith.constant 32 : i32
    %48 = vector.broadcast %c32_i32 : i32 to vector<8x64xi32>
    %49 = arith.cmpi slt, %47, %48 : vector<8x64xi32>
    %50 = arith.select %49, %36, %46 : vector<8x64xi1>, vector<8x64xf32>
    %c0_21 = arith.constant 0 : index
    %c0_22 = arith.constant 0 : index
    %51 = vector.load %arg3[%c0_21, %c0_22] : memref<8x64xf32, #tpu.memory_space<vmem>>, vector<8x64xf32>
    tpu.vector_store %arg3[%c0_21, %c0_22], %50 {strides = array<i32>} : memref<8x64xf32, #tpu.memory_space<vmem>>, vector<8x64xf32>,
    return
  }
}

</mosaic_0001>

<bundles_post_ra>
// kernel: tpu_custom_call.1
= control target key start
LH: loop header
LB: loop body
LE: loop exit
PB: predicated region body
PF: predicated region fallthrough
CT: control target
= control target key end

     0   :  { %v454_v1 = vmov 0.0   ;;  %vm455_vm0 = vmmov 0   ;;  %vm55_vm1 = vcmask 130048   ;;  %vm117_vm2 = vcmask 1043456   ;;  %s556_s0 = inlined_call_operand.vmem [shape: f32[8,16], index: 0, kind: input, shape index: {}]   ;;  %s557_s1 = inlined_call_operand.vmem [shape: f32[8,24], index: 1, kind: input, shape index: {}]   ;;  %s558_s2 = inlined_call_operand.vmem [shape: bf16[192,64], index: 2, kind: input, shape index: {}]   ;;  %s559_s3 = inlined_call_operand.hbm [shape: f32[8,64], index: 3, kind: output, shape index: {}]  }
   0x1   :  { %v415_v0 = vld [vmem:[%s558_s2 + $0x8] sm:$0xff]   ;;  %380 = vmatprep.subr.bf16.mxu1 %v454_v1  ;;  %374 = vmatprep.subr.bf16.mxu0 %v454_v1  ;;  %v416_v2 = vld [vmem:[%s558_s2] sm:$0xff]   ;;  %v417_v4 = vld [vmem:[%s558_s2 + $0x10] ss:$0 sps:$4 sm:$0xff]   ;;  %vm113_vm3 = vcmask 195584  }
   0x2   :  { %381 = vmatpush3.bf16.msra.mxu1 %v415_v0  ;;  %376 = vmatprep.mubr.msk.bf16.mxu0 %vm455_vm0, %v454_v1  ;;  %v41_v3 = vld [vmem:[%s556_s0] sm:$0xff]  ;;  %v418_v7 = vld [vmem:[%s558_s2 + $0x18] sm:$0xff]   ;;  %v119_v8 = vsel %vm117_vm2, %v417_v4, 0 }
   0x3   :  { %375 = vmatpush3.bf16.msra.mxu0 %v416_v2  ;;  %382 = vmatprep.subr.bf16.mxu1 %v454_v1  ;;  %v42_v5 = vpack.c.bf16 %v41_v3, %v41_v3  ;;  %v43_v6 = vld [vmem:[%s557_s1] sm:$0xff] }
   0x4   :  { %384 = vmatprep.mubr.msk.bf16.mxu1 %vm455_vm0, %v454_v1  ;;  %388 = vmatprep.subr.bf16.mxu0 %v454_v1  ;;  %v44_v9 = vpack.c.bf16 %v43_v6, %v43_v6 }
   0x6   :  { %377 = vmatmul.mubr.msk.bf16.vlgmr.msra.gmra.mrb[0].mxu0 %vm55_vm1, %v42_v5  ;;  %383 = vmatpush3.bf16.msra.mxu1 %v119_v8 }
   0x7   :  { %389 = vmatpush3.bf16.msra.mxu0 %v418_v7  ;;  %396 = vmatprep.mubr.msk.bf16.mxu0 %vm455_vm0, %v454_v1 }
   0x8   :  { %390 = vmatprep.subr.bf16.mxu0 %v454_v1  ;;  %400 = vmatprep.subr.bf16.mxu1 %v454_v1 }
   0x9   :  { %385 = vmatmul.mubr.msk.bf16.vlgmr.msra.gmra.mrb[0].mxu1 %vm113_vm3, %v44_v9 }
   0xa   :  { %408 = vmatprep.mubr.msk.bf16.mxu1 %vm455_vm0, %v454_v1 }
   0xb   :  { %8 = vsyncpa [#allocation3], 0  ;;  %v419_v10 = vld [vmem:[%s558_s2 + $0x20] sm:$0xff]   ;;  %v420_v11 = vld [vmem:[%s558_s2 + $0x28] sm:$0xff]   ;;  %v45_v15 = vlaneseq  ;;  %vm192_vm4 = vcmask 523264  }
   0xc   :  { %391 = vmatpush3.bf16.msra.mxu0 %v419_v10  ;;  %v421_v12 = vld [vmem:[%s558_s2 + $0x30] sm:$0xff]   ;;  %v422_v13 = vld [vmem:[%s558_s2 + $0x38] sm:$0xff]   ;;  %v423_v14 = vld [vmem:[%s558_s2 + $0x40] sm:$0xff]  }
   0xd   :  { %392 = vmatprep.subr.bf16.mxu0 %v454_v1  ;;  %401 = vmatpush3.bf16.msra.mxu1 %v422_v13  ;;  %v46_v16 = vshrl.u32 %v45_v15, 7  ;;  %v37_v17 = vld [vmem:[%s558_s2 + $0x58] sm:$0x1]  ;;  %v424_v37 = vld [vmem:[%s558_s2 + $0x48] sm:$0xff]   ;;  %v425_v38 = vld [vmem:[%s558_s2 + $0x50] sm:$0xff]   ;;  %v326_v4 = vand.u32 127, %v45_v15 }
   0xe   :  { %402 = vmatprep.subr.bf16.mxu1 %v454_v1  ;;  %v38_v18 = vunpack.c.l.bf16 %v37_v17  ;;  %v39_v39 = vld [vmem:[%s558_s2 + $0x58] sm:$0x2]  ;;  %s456_s2 = smov [#allocation2]  }
   0xf   :  { %v47_v19 = vsub.s32 0, %v46_v16  ;;  %v102_v20 = vsub.s32 1, %v46_v16  ;;  %v40_v40 = vunpack.c.l.bf16 %v39_v39  ;;  %v166_v41 = vsub.s32 2, %v46_v16  ;;  %s336_s13 = sshll.u32 %s456_s2, 4  ;;  %s337_s13 = int_to_ptr.vmem [resolvable:$true] %s336_s13 }
  0x10   :  { %393 = vmatpush3.bf16.msra.mxu0 %v420_v11  ;;  %v240_v50 = vsub.s32 3, %v46_v16  ;;  %vm327_vm6 = vcmp.lt.s32.totalorder %v326_v4, 32  ;;  %s430_s14 = scalar_lea.vmem %s337_s13, 128  ;;  %p435_p1 = scmp.lt.s32.totalorder %s337_s13, %s337_s13 }
  0x11   :  { %394 = vmatprep.subr.bf16.mxu0 %v454_v1  ;;  %403 = vmatpush3.bf16.msra.mxu1 %v423_v14  ;;  %v48_v21 = vrot.slane %v38_v18, %v47_v19  ;;  %v103_v23 = vrot.slane %v38_v18, %v102_v20  ;;  %v167_v42 = vrot.slane %v40_v40, %v166_v41  ;;  %p431_p0 = scmp.ne.s32.totalorder %s337_s13, %s430_s14  ;;  %p436_p2 = scmp.lt.s32.totalorder %s430_s14, %s430_s14 }
  0x12   :  { %404 = vmatprep.subr.bf16.mxu1 %v454_v1  ;;  %v241_v51 = vrot.slane %v40_v40, %v240_v50 }
  0x13   :  { %p437_p3 = por %p436_p2, %p435_p1 }
  0x14   :  { %395 = vmatpush3.bf16.msra.mxu0 %v421_v12 }
  0x15   :  { %405 = vmatpush3.bf16.msra.mxu1 %v424_v37  ;;  %p438_p4 = pnand %p437_p3, %p431_p0 }
  0x16   :  { %406 = vmatprep.subr.bf16.mxu1 %v454_v1 }
  0x19   :  { %407 = vmatpush3.bf16.msra.mxu1 %v425_v38 }
  0xd9   :  { %v93_v22 = vpop.f32.mrb[0].mxu0 }
  0xda   :  { %v94_v24 = vadd.f32 %v93_v22, %v48_v21  ;;  %v378_v25 = vpop.f32.mrb[1].mxu0 }
  0xdb   :  { %v96_v26 = vpop.f32.mrb[2].mxu0 }
  0xdc   :  { %v379_v27 = vpop.f32.mrb[3].mxu0  ;;  %v155_v28 = vpop.f32.mrb[0].mxu1  ;;  %v99_v29 = vmax.f32 %v94_v24, 0.0 }
  0xdd   :  { %v156_v30 = vadd.f32 %v155_v28, %v103_v23  ;;  %v386_v31 = vpop.f32.mrb[1].mxu1 }
  0xde   :  { %v158_v32 = vpop.f32.mrb[2].mxu1 }
  0xdf   :  { %v161_v33 = vmax.f32 %v156_v30, 0.0  ;;  %v387_v34 = vpop.f32.mrb[3].mxu1 }
  0xe1   :  { %v162_v35 = vadd.f32 %v161_v33, %v99_v29 }
  0xe3   :  { %v163_v36 = vpack.c.bf16 %v162_v35, %v162_v35 }
  0xe5   :  { %397 = vmatmul.mubr.msk.bf16.vlgmr.msra.gmra.mrb[4].mxu0 %vm192_vm4, %v163_v36 }
 0x1b8   :  { %v230_v43 = vpop.f32.mrb[4].mxu0 }
 0x1b9   :  { %v231_v44 = vadd.f32 %v230_v43, %v167_v42  ;;  %v398_v45 = vpop.f32.mrb[5].mxu0 }
 0x1ba   :  { %v233_v46 = vpop.f32.mrb[6].mxu0 }
 0x1bb   :  { %v236_v47 = vmax.f32 %v231_v44, 0.0  ;;  %v399_v48 = vpop.f32.mrb[7].mxu0 }
 0x1bd   :  { %v237_v49 = vpack.c.bf16 %v236_v47, %v236_v47 }
 0x1bf   :  { %409 = vmatmul.mubr.msk.bf16.vlgmr.msra.gmra.mrb[4].mxu1 %vm192_vm4, %v237_v49 }
 0x292   :  { %v303_v52 = vpop.f32.mrb[4].mxu1 }
 0x293   :  { %v304_v53 = vadd.f32 %v303_v52, %v241_v51  ;;  %v410_v54 = vpop.f32.mrb[5].mxu1 }
 0x294   :  { %v306_v55 = vpop.f32.mrb[6].mxu1 }
 0x295   :  { %v310_v56 = vand.u32 2147483647, %v304_v53  ;;  %v411_v57 = vpop.f32.mrb[7].mxu1  ;;  %v309_v5 = vmax.f32 %v304_v53, 0.0 }
 0x297   :  { %v311_v58 = vsub.f32 0.0, %v310_v56 }
 0x299   :  { %v312_v59 = vmul.f32 1.442695, %v311_v58 }
 0x29b   :  { %426 = vpow2.f32 %v312_v59 }
 0x2a5   :  { %v427_v60 = vpop.eup %426 }
 0x2a6   :  { %v314_v61 = vadd.f32 1.0, %v427_v60  ;;  %v317_v62 = vmul.f32 -0.5, %v427_v60  ;;  %v320_v0 = vand.u32 2147483647, %v427_v60 }
 0x2a8   :  { %428 = vlog2.f32 %v314_v61  ;;  %v318_v63 = vadd.f32 1.0, %v317_v62  ;;  %vm321_vm5 = vcmp.lt.f32.partialorder %v320_v0, 0.0004427343 }
 0x2aa   :  { %v319_v3 = vmul.f32 %v427_v60, %v318_v63 }
 0x2b2   :  { %v429_v1 = vpop.eup %428 }
 0x2b3   :  { %v316_v2 = vmul.f32 0.6931472, %v429_v1 }
 0x2b5   :  { %v322_v6 = vsel %vm321_vm5, %v319_v3, %v316_v2 }
 0x2b6   :  { %v323_v7 = vadd.f32 %v322_v6, %v309_v5 }
 0x2b8   :  { %v324_v8 = vadd.f32 1e-08, %v323_v7 }
 0x2ba   :  { %v328_v9 = vsel %vm327_vm6, %v304_v53, %v324_v8 }
 0x2bb   :  { %329 = vst.msk [vmem:[#allocation2] sm:$0xff] %vm192_vm4, %v328_v9 }
 0x2bc   :  { %441 = shalt.err (!%p438_p4)
}
 0x2bd   :  { %s442_s17 = scalar_lea.hbm %s559_s3, 128 }
 0x2be   :  { %p443_p5 = scmp.ne.s32.totalorder %s559_s3, %s442_s17  ;;  %p446_p6 = scmp.lt.u32.totalorder %s442_s17, %s559_s3 }
 0x2c0   :  { %p448_p7 = pnand %p446_p6, %p443_p5 }
 0x2c2   :  { %451 = shalt.err (!%p448_p7)
}
 0x2c3   :  { %339 = dma.vmem_to_hbm [thread:$0]  %s337_s13, 128, %s559_s3, [#allocation3]  }
 0x2c4   :  { %452 = dma.done.wait [#allocation3], 128  }
 0x2c5   :  { %453 = vsyncadd [#allocation3], 4294967168 }
 0x2c6   :  { %343 = vsyncpa [#allocation3], 1 }

</bundles_post_ra>
